<compile_context>
chip_gen: v5e
topology: v5e:2x2
jax: 0.10.0
libtpu: 0.0.40
codegen_flags: <defaults>
</compile_context>

<pallas_src>
import jax
import jax.numpy as jnp
from jax.experimental import pallas as pl
from jax.experimental.pallas import tpu as pltpu


def partial_fc_kernel(f_ref, w_ref, o_ref, wn_ref):
    # f_ref : (tb, E)   features tile
    # w_ref : (tc, E)   raw (un-normalized) class-weight tile
    # o_ref : (tb, tc)  logits tile
    # wn_ref: (tc, E)   VMEM scratch holding the normalized weight tile,
    #                   reused across all batch tiles of the current class tile.

    # Normalize the weight tile only at the start of the (inner, sequential)
    # batch loop; it is then reused for every batch tile of this class tile.
    @pl.when(pl.program_id(1) == 0)
    def _():
        w = w_ref[...].astype(jnp.float32)
        sq = jnp.sum(w * w, axis=-1, keepdims=True)
        # torch F.normalize: w / max(||w||, 1e-12) == w * rsqrt(max(||w||^2, 1e-24))
        inv = jax.lax.rsqrt(jnp.maximum(sq, 1e-24))
        wn_ref[...] = (w * inv).astype(wn_ref.dtype)

    f = f_ref[...].astype(wn_ref.dtype)
    # features @ norm_weight.T expressed by contracting the last dim of both
    # operands (MXU-native transposed-RHS form, no explicit transpose).
    logits = jax.lax.dot_general(
        f, wn_ref[...],
        dimension_numbers=(((1,), (1,)), ((), ())),
        preferred_element_type=jnp.float32,
    )
    o_ref[...] = logits.astype(o_ref.dtype)


def _pick_tile(dim, target, quantum):
    """Largest tile <= target that divides `dim` and is a multiple of
    `quantum`; falls back to the full dimension (always a legal block)."""
    if dim <= target:
        return dim
    t = (target // quantum) * quantum
    while t >= quantum:
        if dim % t == 0:
            return t
        t -= quantum
    return dim


def partial_fc_forward(features, weight, *, tb=256, tc=512,
                       compute_dtype=jnp.bfloat16,
                       vmem_limit_bytes=48 * 1024 * 1024):
    """features: [B, E], weight: [C, E] (un-normalized). Returns f32 [B, C]."""
    B, E = features.shape
    C, E2 = weight.shape
    assert E == E2
    tb = _pick_tile(B, tb, 8)     # sublane quantum
    tc = _pick_tile(C, tc, 128)   # lane quantum -> lane-dense output tile
    assert B % tb == 0 and C % tc == 0

    # Class axis outermost / batch axis innermost so the normalized-weight
    # scratch is reused across all batch tiles of one class tile.  The batch
    # axis carries the scratch dependency -> "arbitrary"; the class axis is
    # "parallel" (megacore-shardable on v7x).
    grid = (C // tc, B // tb)

    # TODO(synk): for very large embedding dims (>= ~2048) a third "arbitrary"
    # grid axis over E with a (tb, tc) f32 accumulator would be needed to stay
    # within VMEM; PartialFC's default embedding_size=512 fits whole per tile.
    return pl.pallas_call(
        partial_fc_kernel,
        out_shape=jax.ShapeDtypeStruct((B, C), jnp.float32),
        grid_spec=pltpu.PrefetchScalarGridSpec(
            num_scalar_prefetch=0,
            grid=grid,
            in_specs=[
                pl.BlockSpec((tb, E), lambda j, i: (i, 0)),   # features tile
                pl.BlockSpec((tc, E), lambda j, i: (j, 0)),   # raw weight tile
            ],
            out_specs=pl.BlockSpec((tb, tc), lambda j, i: (i, j)),
            scratch_shapes=[pltpu.VMEM((tc, E), compute_dtype)],
        ),
        compiler_params=pltpu.CompilerParams(
            dimension_semantics=("parallel", "arbitrary"),
            vmem_limit_bytes=vmem_limit_bytes,
        ),
    )(features, weight)


def partial_fc_forward_ref(features, weight):
    """Pure-JAX f32 reference matching torch F.normalize + F.linear."""
    norm = jnp.sqrt(jnp.sum(weight * weight, axis=1, keepdims=True))
    w_norm = weight / jnp.maximum(norm, 1e-12)
    return features @ w_norm.T


if __name__ == "__main__":
    # Small synthetic configuration (sample_rate = 1.0 path: sub_weight is the
    # full local weight):  batch=16, embedding=128, num_local classes=256.
    B, E, C = 16, 128, 256

    key = jax.random.PRNGKey(0)
    kf, kw = jax.random.split(key)
    features = jax.random.normal(kf, (B, E), dtype=jnp.float32)
    # __init__: weight = torch.normal(0, 0.01, (num_local, embedding_size))
    weight = 0.01 * jax.random.normal(kw, (C, E), dtype=jnp.float32)

    ref = partial_fc_forward_ref(features, weight)

    # Default fast path: bf16 MXU operands, f32 accumulation.
    logits_bf16 = jax.block_until_ready(partial_fc_forward(features, weight))
    assert logits_bf16.shape == (B, C)
    assert jnp.allclose(logits_bf16, ref, atol=2e-2, rtol=2e-2), (
        f"bf16 path max abs err = {jnp.max(jnp.abs(logits_bf16 - ref))}")

    # Exact-f32 path matches the torch reference tightly.
    logits_f32 = jax.block_until_ready(
        partial_fc_forward(features, weight, compute_dtype=jnp.float32))
    assert jnp.allclose(logits_f32, ref, atol=1e-4, rtol=1e-4), (
        f"f32 path max abs err = {jnp.max(jnp.abs(logits_f32 - ref))}")

    # TODO(synk): sampling / forward_backward / optimizer-state mutation are
    # training-loop host logic (torch.distributed, in-place param swaps) with
    # no kernel-level equivalent; only the forward hot path is implemented.
    print("KERNEL_OK")
</pallas_src>

<mosaic_0001>
module attributes {stable_mosaic.version = 11 : i64} {
  func.func @partial_fc_kernel(%arg0: i32, %arg1: i32, %arg2: memref<16x128xf32, #tpu.memory_space<vmem>>, %arg3: memref<256x128xf32, #tpu.memory_space<vmem>>, %arg4: memref<16x256xf32, #tpu.memory_space<vmem>>, %arg5: memref<256x128xbf16, #tpu.memory_space<vmem>>) attributes {dimension_semantics = [#tpu.dimension_semantics<parallel>, #tpu.dimension_semantics<arbitrary>], iteration_bounds = array<i64: 1, 1>, scalar_prefetch = 0 : i64, scratch_operands = 1 : i64, tpu.core_type = #tpu.core_type<tc>, window_params = [{transform_indices = @transform_0, window_bounds = array<i64: 16, 128>}, {transform_indices = @transform_1, window_bounds = array<i64: 256, 128>}, {transform_indices = @transform_2, window_bounds = array<i64: 16, 256>}]} {
    %c0_i32 = arith.constant 0 : i32
    %0 = arith.cmpi eq, %arg1, %c0_i32 : i32
    %1 = arith.extui %0 : i1 to i32
    %c0_i32_0 = arith.constant 0 : i32
    %2 = arith.cmpi ne, %1, %c0_i32_0 : i32
    scf.if %2 {
      %c0_6 = arith.constant 0 : index
      %c0_7 = arith.constant 0 : index
      %8 = vector.load %arg3[%c0_6, %c0_7] : memref<256x128xf32, #tpu.memory_space<vmem>>, vector<256x128xf32>
      %9 = arith.mulf %8, %8 : vector<256x128xf32>
      %cst_8 = arith.constant dense<0.000000e+00> : vector<256xf32>
      %10 = vector.multi_reduction <add>, %9, %cst_8 [1] : vector<256x128xf32> to vector<256xf32>
      %11 = vector.shape_cast %10 : vector<256xf32> to vector<256x1xf32>
      %cst_9 = arith.constant 1.000000e-24 : f32
      %12 = vector.broadcast %cst_9 : f32 to vector<256x1xf32>
      %13 = arith.maximumf %11, %12 : vector<256x1xf32>
      %14 = math.rsqrt %13 : vector<256x1xf32>
      %15 = vector.broadcast %14 : vector<256x1xf32> to vector<256x128xf32>
      %16 = arith.mulf %8, %15 : vector<256x128xf32>
      %17 = arith.truncf %16 : vector<256x128xf32> to vector<256x128xbf16>
      %c0_10 = arith.constant 0 : index
      %c0_11 = arith.constant 0 : index
      %18 = vector.load %arg5[%c0_10, %c0_11] : memref<256x128xbf16, #tpu.memory_space<vmem>>, vector<256x128xbf16>
      tpu.vector_store %arg5[%c0_10, %c0_11], %17 {strides = array<i32>} : memref<256x128xbf16, #tpu.memory_space<vmem>>, vector<256x128xbf16>,
    } else {
    }
    %c0 = arith.constant 0 : index
    %c0_1 = arith.constant 0 : index
    %3 = vector.load %arg2[%c0, %c0_1] : memref<16x128xf32, #tpu.memory_space<vmem>>, vector<16x128xf32>
    %4 = arith.truncf %3 : vector<16x128xf32> to vector<16x128xbf16>
    %c0_2 = arith.constant 0 : index
    %c0_3 = arith.constant 0 : index
    %5 = vector.load %arg5[%c0_2, %c0_3] : memref<256x128xbf16, #tpu.memory_space<vmem>>, vector<256x128xbf16>
    %cst = arith.constant dense<0.000000e+00> : vector<16x256xf32>
    %6 = tpu.matmul %4, %5, %cst {dimension_numbers = #tpu.dot_dimension_numbers<[1], [1], [0], [0], [0, 0, 1, 0], [], []>} : vector<16x128xbf16>, vector<256x128xbf16>, vector<16x256xf32> -> vector<16x256xf32>
    %c0_4 = arith.constant 0 : index
    %c0_5 = arith.constant 0 : index
    %7 = vector.load %arg4[%c0_4, %c0_5] : memref<16x256xf32, #tpu.memory_space<vmem>>, vector<16x256xf32>
    tpu.vector_store %arg4[%c0_4, %c0_5], %6 {strides = array<i32>} : memref<16x256xf32, #tpu.memory_space<vmem>>, vector<16x256xf32>,
    return
  }
  func.func @transform_0(%arg0: i32, %arg1: i32) -> (i32, i32) {
    %c0_i32 = arith.constant 0 : i32
    %c0_i32_0 = arith.constant 0 : i32
    return %arg1, %c0_i32 : i32, i32
  }
  func.func @transform_1(%arg0: i32, %arg1: i32) -> (i32, i32) {
    %c0_i32 = arith.constant 0 : i32
    %c0_i32_0 = arith.constant 0 : i32
    return %arg0, %c0_i32 : i32, i32
  }
  func.func @transform_2(%arg0: i32, %arg1: i32) -> (i32, i32) {
    %c0_i32 = arith.constant 0 : i32
    return %arg1, %arg0 : i32, i32
  }
}

</mosaic_0001>

<bundles_post_ra>
// kernel: tpu_custom_call.1
= control target key start
LH: loop header
LB: loop body
LE: loop exit
PB: predicated region body
PF: predicated region fallthrough
CT: control target
= control target key end

     0   :  { %7 = vsyncpa [#allocation4], 0  ;;  %s1855_s0 = inlined_call_operand.hbm [shape: f32[16,128], index: 0, kind: input, shape index: {}]   ;;  %s1856_s1 = inlined_call_operand.hbm [shape: f32[256,128], index: 1, kind: input, shape index: {}]   ;;  %s1857_s2 = inlined_call_operand.hbm [shape: f32[16,256], index: 2, kind: output, shape index: {}]  }
   0x1   :  { %8 = vsyncpa [#allocation7], 0 }
   0x2   :  { %9 = vsyncpa [#allocation5], 0  ;;  %s14_s11 = sshll.u32 %s1855_s0, 4  ;;  %s1131_s12 = smov [#allocation3]   ;;  %s15_s11 = int_to_ptr.hbm [resolvable:$true] %s14_s11 }
   0x3   :  { %s16_s13 = sshll.u32 %s1131_s12, 4  ;;  %s27_s16 = sshll.u32 %s1856_s1, 4  ;;  %s17_s13 = int_to_ptr.vmem [resolvable:$true] %s16_s13  ;;  %s28_s16 = int_to_ptr.hbm [resolvable:$true] %s27_s16 }
   0x4   :  { %s1132_s17 = smov 128   ;;  %s1133_s18 = smov 8  }
   0x5   :  { %22 = dma.hbm_to_vmem [thread:$0]  %s15_s11, 256, %s17_s13, [#allocation4], %s1132_s17, %s1132_s17, %s1133_s18  }
   0x6   :  { %s1134_s19 = smov [#allocation6]  }
   0x7   :  { %s29_s20 = sshll.u32 %s1134_s19, 4  ;;  %s30_s20 = int_to_ptr.vmem [resolvable:$true] %s29_s20 }
   0x8   :  { %35 = dma.hbm_to_vmem [thread:$0]  %s28_s16, 4096, %s30_s20, [#allocation7], %s1132_s17, %s1132_s17, %s1133_s18  }
   0x9   :  { %1125 = dma.done.wait [#allocation4], 256  }
   0xa   :  { %1126 = vsyncadd [#allocation4], 4294967040 }
   0xb   :  { %1127 = dma.done.wait [#allocation7], 4096  }
   0xc   :  { %1128 = vsyncadd [#allocation7], 4294963200  ;;  %v1159_v0 = vld [vmem:[#allocation6 + $0xf0] sm:$0xff]  ;;  %v1163_v2 = vld [vmem:[#allocation6 + $0x60] sm:$0xff]  ;;  %s1135_s0 = smov [#allocation8]   ;;  %s793_s23 = sshll.u32 %s1857_s2, 4  ;;  %s794_s23 = int_to_ptr.hbm [resolvable:$true] %s793_s23 }
   0xd   :  { %v1161_v1 = vld [vmem:[#allocation6 + $0x70] sm:$0xff]  ;;  %v110_v3 = vmul.f32 %v1159_v0, %v1159_v0  ;;  %v92_v5 = vmul.f32 %v1163_v2, %v1163_v2  ;;  %v1171_v6 = vld [vmem:[#allocation6 + $0xf8] sm:$0xff]  ;;  %v1175_v8 = vld [vmem:[#allocation6 + $0x68] sm:$0xff]  ;;  %s791_s1 = sshll.u32 %s1135_s0, 4  ;;  %s1136_s24 = smov 256   ;;  %s792_s1 = int_to_ptr.vmem [resolvable:$true] %s791_s1 }
   0xe   :  { %v94_v4 = vmul.f32 %v1161_v1, %v1161_v1  ;;  %v1173_v7 = vld [vmem:[#allocation6 + $0x78] sm:$0xff]  ;;  %v111_v9 = vmul.f32 %v1171_v6, %v1171_v6  ;;  %v93_v11 = vmul.f32 %v1175_v8, %v1175_v8  ;;  %v1183_v12 = vld [vmem:[#allocation6 + $0xe8] sm:$0xff]  ;;  %v1185_v13 = vld [vmem:[#allocation6 + $0xe0] sm:$0xff]  ;;  %s1137_s25 = smov 16  }
   0xf   :  { %172 = vadd.xlane.f32.xlu1 %v110_v3  ;;  %136 = vadd.xlane.f32.xlu2 %v92_v5  ;;  %v95_v10 = vmul.f32 %v1173_v7, %v1173_v7  ;;  %v1187_v14 = vld [vmem:[#allocation6 + $0x50] sm:$0xff]  ;;  %v109_v15 = vmul.f32 %v1183_v12, %v1183_v12  ;;  %v108_v16 = vmul.f32 %v1185_v13, %v1185_v13  ;;  %v1197_v19 = vld [vmem:[#allocation6 + $0x58] sm:$0xff]  ;;  %v1207_v24 = vld [vmem:[#allocation6 + $0x48] sm:$0xff] }
  0x10   :  { %140 = vadd.xlane.f32.xlu0 %v94_v4  ;;  %v90_v17 = vmul.f32 %v1187_v14, %v1187_v14  ;;  %v1195_v18 = vld [vmem:[#allocation6 + $0xd0] sm:$0xff]  ;;  %v1199_v20 = vld [vmem:[#allocation6 + $0xd8] sm:$0xff]  ;;  %v91_v22 = vmul.f32 %v1197_v19, %v1197_v19  ;;  %v1209_v25 = vld [vmem:[#allocation6 + $0x40] sm:$0xff]  ;;  %v89_v27 = vmul.f32 %v1207_v24, %v1207_v24 }
  0x11   :  { %v106_v21 = vmul.f32 %v1195_v18, %v1195_v18  ;;  %v107_v23 = vmul.f32 %v1199_v20, %v1199_v20  ;;  %v1211_v26 = vld [vmem:[#allocation6 + $0xc0] sm:$0xff]  ;;  %v88_v28 = vmul.f32 %v1209_v25, %v1209_v25  ;;  %v1219_v30 = vld [vmem:[#allocation6 + $0xc8] sm:$0xff]  ;;  %v1221_v31 = vld [vmem:[#allocation6 + $0x30] sm:$0xff] }
  0x12   :  { %v104_v29 = vmul.f32 %v1211_v26, %v1211_v26  ;;  %v1223_v32 = vld [vmem:[#allocation6 + $0x38] sm:$0xff]  ;;  %v105_v33 = vmul.f32 %v1219_v30, %v1219_v30  ;;  %v86_v34 = vmul.f32 %v1221_v31, %v1221_v31  ;;  %v1231_v36 = vld [vmem:[#allocation6 + $0xb0] sm:$0xff]  ;;  %v1235_v38 = vld [vmem:[#allocation6 + $0x20] sm:$0xff] }
  0x13   :  { %v87_v35 = vmul.f32 %v1223_v32, %v1223_v32  ;;  %v1233_v37 = vld [vmem:[#allocation6 + $0xb8] sm:$0xff]  ;;  %v102_v39 = vmul.f32 %v1231_v36, %v1231_v36  ;;  %v84_v41 = vmul.f32 %v1235_v38, %v1235_v38  ;;  %v1243_v42 = vld [vmem:[#allocation6 + $0xa0] sm:$0xff]  ;;  %v1245_v43 = vld [vmem:[#allocation6 + $0x28] sm:$0xff] }
  0x14   :  { %v103_v40 = vmul.f32 %v1233_v37, %v1233_v37  ;;  %v1247_v44 = vld [vmem:[#allocation6 + $0xa8] sm:$0xff]  ;;  %v100_v45 = vmul.f32 %v1243_v42, %v1243_v42  ;;  %v85_v46 = vmul.f32 %v1245_v43, %v1245_v43  ;;  %v1255_v48 = vld [vmem:[#allocation6 + $0x18] sm:$0xff]  ;;  %v1257_v49 = vld [vmem:[#allocation6 + $0x10] sm:$0xff] }
  0x15   :  { %v101_v47 = vmul.f32 %v1247_v44, %v1247_v44  ;;  %v1259_v50 = vld [vmem:[#allocation6 + $0x90] sm:$0xff]  ;;  %v83_v51 = vmul.f32 %v1255_v48, %v1255_v48  ;;  %v82_v52 = vmul.f32 %v1257_v49, %v1257_v49  ;;  %v1267_v54 = vld [vmem:[#allocation6 + $0x98] sm:$0xff]  ;;  %v1269_v55 = vld [vmem:[#allocation6] sm:$0xff] }
  0x16   :  { %v98_v53 = vmul.f32 %v1259_v50, %v1259_v50  ;;  %v1271_v56 = vld [vmem:[#allocation6 + $0x8] sm:$0xff]  ;;  %v99_v57 = vmul.f32 %v1267_v54, %v1267_v54  ;;  %v80_v58 = vmul.f32 %v1269_v55, %v1269_v55  ;;  %v1279_v60 = vld [vmem:[#allocation6 + $0x80] sm:$0xff] }
  0x17   :  { %174 = vadd.xlane.f32.xlu1 %v111_v9  ;;  %138 = vadd.xlane.f32.xlu2 %v93_v11  ;;  %v81_v59 = vmul.f32 %v1271_v56, %v1271_v56  ;;  %v1281_v61 = vld [vmem:[#allocation6 + $0x88] sm:$0xff]  ;;  %v96_v62 = vmul.f32 %v1279_v60, %v1279_v60 }
  0x18   :  { %142 = vadd.xlane.f32.xlu0 %v95_v10  ;;  %v97_v63 = vmul.f32 %v1281_v61, %v1281_v61 }
  0x1f   :  { %170 = vadd.xlane.f32.xlu1 %v109_v15  ;;  %132 = vadd.xlane.f32.xlu2 %v90_v17 }
  0x20   :  { %168 = vadd.xlane.f32.xlu0 %v108_v16 }
  0x27   :  { %164 = vadd.xlane.f32.xlu1 %v106_v21  ;;  %166 = vadd.xlane.f32.xlu2 %v107_v23 }
  0x28   :  { %134 = vadd.xlane.f32.xlu0 %v91_v22 }
  0x2f   :  { %130 = vadd.xlane.f32.xlu1 %v89_v27  ;;  %160 = vadd.xlane.f32.xlu2 %v104_v29 }
  0x30   :  { %128 = vadd.xlane.f32.xlu0 %v88_v28 }
  0x37   :  { %124 = vadd.xlane.f32.xlu1 %v86_v34  ;;  %126 = vadd.xlane.f32.xlu2 %v87_v35 }
  0x38   :  { %162 = vadd.xlane.f32.xlu0 %v105_v33 }
  0x3f   :  { %158 = vadd.xlane.f32.xlu1 %v103_v40  ;;  %120 = vadd.xlane.f32.xlu2 %v84_v41 }
  0x40   :  { %156 = vadd.xlane.f32.xlu0 %v102_v39 }
  0x47   :  { %152 = vadd.xlane.f32.xlu1 %v100_v45  ;;  %154 = vadd.xlane.f32.xlu2 %v101_v47 }
  0x48   :  { %122 = vadd.xlane.f32.xlu0 %v85_v46 }
  0x4f   :  { %118 = vadd.xlane.f32.xlu1 %v83_v51  ;;  %148 = vadd.xlane.f32.xlu2 %v98_v53 }
  0x50   :  { %116 = vadd.xlane.f32.xlu0 %v82_v52 }
  0x57   :  { %112 = vadd.xlane.f32.xlu1 %v80_v58  ;;  %114 = vadd.xlane.f32.xlu2 %v81_v59 }
  0x58   :  { %150 = vadd.xlane.f32.xlu0 %v99_v57 }
  0x5f   :  { %146 = vadd.xlane.f32.xlu1 %v97_v63 }
  0x60   :  { %144 = vadd.xlane.f32.xlu0 %v96_v62 }
  0x82   :  { %v173_v3 = vpop.xlane.xlu1 %172  ;;  %v137_v10 = vpop.xlane.xlu2 %136 }
  0x83   :  { %v141_v4 = vpop.xlane.xlu0 %140  ;;  %v206_v5 = vmax.f32 %v173_v3, 1e-24  ;;  %v1289_v11 = vmax.f32 %v137_v10, 1e-24 }
  0x84   :  { %v1287_v9 = vmax.f32 %v141_v4, 1e-24 }
  0x85   :  { %989 = vrsqrt.f32 %v206_v5  ;;  %vm514_vm0 = vweird.f32 %v206_v5  ;;  %vm334_vm4 = vweird.f32 %v1289_v11 }
  0x86   :  { %991 = vrsqrt.f32 %v1287_v9  ;;  %vm354_vm1 = vweird.f32 %v1287_v9 }
  0x87   :  { %993 = vrsqrt.f32 %v1289_v11 }
  0x8a   :  { %v175_v15 = vpop.xlane.xlu1 %174  ;;  %v139_v23 = vpop.xlane.xlu2 %138 }
  0x8b   :  { %v143_v16 = vpop.xlane.xlu0 %142  ;;  %v1293_v17 = vpop.eup %989  ;;  %v1295_v21 = vmax.f32 %v175_v15, 1e-24  ;;  %v1302_v29 = vmax.f32 %v139_v23, 1e-24 }
  0x8c   :  { %v1297_v22 = vmax.f32 %v143_v16, 1e-24  ;;  %v1299_v27 = vpop.eup %991  ;;  %v509_v28 = vmul.f32 %v1293_v17, %v206_v5  ;;  %vm515_vm2 = vweird.f32 %v1293_v17 }
  0x8d   :  { %v1304_v33 = vpop.eup %993  ;;  %v349_v34 = vmul.f32 %v1299_v27, %v1287_v9  ;;  %995 = vrsqrt.f32 %v1295_v21  ;;  %vm355_vm3 = vweird.f32 %v1299_v27  ;;  %vm524_vm5 = vweird.f32 %v1295_v21  ;;  %vm1346_vm10 = vmor %vm514_vm0, %vm515_vm2 }
  0x8e   :  { %v510_v35 = vmul.f32 %v1293_v17, %v509_v28  ;;  %v329_v39 = vmul.f32 %v1304_v33, %v1289_v11  ;;  %997 = vrsqrt.f32 %v1297_v22  ;;  %vm335_vm6 = vweird.f32 %v1304_v33  ;;  %vm1359_vm12 = vmor %vm354_vm1, %vm355_vm3 }
  0x8f   :  { %v350_v40 = vmul.f32 %v1299_v27, %v349_v34  ;;  %999 = vrsqrt.f32 %v1302_v29  ;;  %vm364_vm7 = vweird.f32 %v1297_v22  ;;  %vm344_vm9 = vweird.f32 %v1302_v29  ;;  %vm1378_vm13 = vmor %vm334_vm4, %vm335_vm6 }
  0x90   :  { %v511_v41 = vmul.f32 0.5, %v510_v35  ;;  %v330_v45 = vmul.f32 %v1304_v33, %v329_v39 }
  0x91   :  { %v351_v46 = vmul.f32 0.5, %v350_v40 }
  0x92   :  { %v512_v47 = vsub.f32 1.5, %v511_v41  ;;  %v331_v51 = vmul.f32 0.5, %v330_v45  ;;  %v171_v52 = vpop.xlane.xlu1 %170  ;;  %v133_v62 = vpop.xlane.xlu2 %132 }
  0x93   :  { %v169_v53 = vpop.xlane.xlu0 %168  ;;  %v1316_v57 = vpop.eup %995  ;;  %v352_v58 = vsub.f32 1.5, %v351_v46  ;;  %v1319_v59 = vmax.f32 %v171_v52, 1e-24 }
  0x94   :  { %v998_v63 = vpop.eup %997  ;;  %v519_v3 = vmul.f32 %v1316_v57, %v1295_v21  ;;  %v332_v10 = vsub.f32 1.5, %v331_v51  ;;  %v1330_v16 = vmax.f32 %v169_v53, 1e-24  ;;  %v513_v23 = vmul.f32 %v1293_v17, %v512_v47 }
  0x95   :  { %v1326_v4 = vpop.eup %999  ;;  %v359_v15 = vmul.f32 %v998_v63, %v1297_v22  ;;  %1001 = vrsqrt.f32 %v1319_v59  ;;  %v353_v35 = vmul.f32 %v1299_v27, %v352_v58  ;;  %vm525_vm8 = vweird.f32 %v1316_v57 }
  0x96   :  { %v520_v28 = vmul.f32 %v1316_v57, %v519_v3  ;;  %v339_v34 = vmul.f32 %v1326_v4, %v1302_v29  ;;  %v333_v46 = vmul.f32 %v1304_v33, %v332_v10  ;;  %vm365_vm11 = vweird.f32 %v998_v63  ;;  %vm526_vm15 = vmor %vm524_vm5, %vm525_vm8 }
  0x97   :  { %v360_v39 = vmul.f32 %v998_v63, %v359_v15  ;;  %1003 = vrsqrt.f32 %v1330_v16  ;;  %v517_v51 = vsel %vm1346_vm10, %v1293_v17, %v513_v23  ;;  %v1363_v58 = vmax.f32 %v133_v62, 1e-24  ;;  %vm366_vm0 = vmor %vm364_vm7, %vm365_vm11 }
  0x98   :  { %v521_v40 = vmul.f32 0.5, %v520_v28  ;;  %v340_v41 = vmul.f32 %v1326_v4, %v339_v34  ;;  %v357_v17 = vsel %vm1359_vm12, %v1299_v27, %v353_v35  ;;  %vm345_vm14 = vweird.f32 %v1326_v4 }
  0x99   :  { %v361_v47 = vmul.f32 0.5, %v360_v39  ;;  %v558_v35 = vmul.f32 %v517_v51, %v1159_v0  ;;  %1005 = vrsqrt.f32 %v1363_v58  ;;  %v542_v21 = vmul.f32 %v357_v17, %v1161_v1  ;;  %vm346_vm1 = vmor %vm344_vm9, %vm345_vm14 }
  0x9a   :  { %v522_v52 = vsub.f32 1.5, %v521_v40  ;;  %v341_v53 = vmul.f32 0.5, %v340_v41  ;;  %v165_v3 = vpop.xlane.xlu1 %164  ;;  %v167_v34 = vpop.xlane.xlu2 %166  ;;  %v337_v41 = vsel %vm1378_vm13, %v1304_v33, %v333_v46  ;;  %vm504_vm3 = vweird.f32 %v1319_v59 }
  0x9b   :  { %v135_v10 = vpop.xlane.xlu0 %134  ;;  %v1365_v15 = vpop.eup %1001  ;;  %v362_v23 = vsub.f32 1.5, %v361_v47  ;;  %v1370_v28 = vmax.f32 %v165_v3, 1e-24  ;;  %v540_v1 = vmul.f32 %v337_v41, %v1163_v2  ;;  %vm494_vm4 = vweird.f32 %v1330_v16 }
  0x9c   :  { %v1372_v9 = vmax.f32 %v135_v10, 1e-24  ;;  %v523_v39 = vmul.f32 %v1316_v57, %v522_v52  ;;  %v342_v40 = vsub.f32 1.5, %v341_v53  ;;  %v499_v27 = vmul.f32 %v1365_v15, %v1319_v59 }
  0x9d   :  { %v363_v11 = vmul.f32 %v998_v63, %v362_v23  ;;  %1007 = vrsqrt.f32 %v1370_v28  ;;  %v1402_v33 = vpop.eup %1003  ;;  %vm505_vm2 = vweird.f32 %v1365_v15  ;;  %vm314_vm7 = vweird.f32 %v1363_v58 }
  0x9e   :  { %v527_v45 = vsel %vm526_vm15, %v1316_v57, %v523_v39  ;;  %v343_v0 = vmul.f32 %v1326_v4, %v342_v40  ;;  %v500_v47 = vmul.f32 %v1365_v15, %v499_v27  ;;  %1009 = vrsqrt.f32 %v1372_v9  ;;  %vm1437_vm5 = vmor %vm504_vm3, %vm505_vm2 }
  0x9f   :  { %v559_v46 = vmul.f32 %v527_v45, %v1171_v6  ;;  %v367_v51 = vsel %vm366_vm0, %v998_v63, %v363_v11  ;;  %v489_v52 = vmul.f32 %v1402_v33, %v1330_v16  ;;  %v1417_v63 = vmax.f32 %v167_v34, 1e-24 }
  0xa0   :  { %v543_v22 = vmul.f32 %v367_v51, %v1173_v7  ;;  %v347_v57 = vsel %vm346_vm1, %v1326_v4, %v343_v0  ;;  %v501_v5 = vmul.f32 0.5, %v500_v47  ;;  %v1421_v4 = vpop.eup %1005  ;;  %vm495_vm6 = vweird.f32 %v1402_v33 }
  0xa1   :  { %v965_v53 = vpack.c.bf16 %v559_v46, %v558_v35  ;;  %v541_v6 = vmul.f32 %v347_v57, %v1175_v8  ;;  %v490_v10 = vmul.f32 %v1402_v33, %v489_v52  ;;  %1011 = vrsqrt.f32 %v1417_v63  ;;  %vm496_vm10 = vmor %vm494_vm4, %vm495_vm6 }
  0xa2   :  { %v925_v3 = vpack.c.bf16 %v543_v22, %v542_v21  ;;  %v502_v29 = vsub.f32 1.5, %v501_v5  ;;  %v131_v7 = vpop.xlane.xlu1 %130  ;;  %v161_v2 = vpop.xlane.xlu2 %160  ;;  %v309_v40 = vmul.f32 %v1421_v4, %v1363_v58  ;;  %vm474_vm8 = vweird.f32 %v1370_v28 }
  0xa3   :  { %v129_v17 = vpop.xlane.xlu0 %128  ;;  %981 = vst [vmem:[#allocation2 + $0x28] sm:$0xff] %v965_v53   ;;  %v920_v23 = vpack.c.bf16 %v541_v6, %v540_v1  ;;  %v1425_v8 = vmax.f32 %v131_v7, 1e-24  ;;  %v1427_v34 = vpop.eup %1007  ;;  %v491_v39 = vmul.f32 0.5, %v490_v10  ;;  %v1444_v41 = vmax.f32 %v161_v2, 1e-24 }
  0xa4   :  { %973 = vst [vmem:[#allocation2 + $0x48] sm:$0xff] %v925_v3   ;;  %v503_v62 = vmul.f32 %v1365_v15, %v502_v29  ;;  %v1433_v27 = vpop.eup %1009  ;;  %v469_v35 = vmul.f32 %v1427_v34, %v1370_v28  ;;  %v310_v0 = vmul.f32 %v1421_v4, %v309_v40  ;;  %vm315_vm9 = vweird.f32 %v1421_v4 }
  0xa5   :  { %972 = vst [vmem:[#allocation2 + $0x8] sm:$0xff] %v920_v23   ;;  %1013 = vrsqrt.f32 %v1425_v8  ;;  %v492_v45 = vsub.f32 1.5, %v491_v39  ;;  %v319_v47 = vmul.f32 %v1433_v27, %v1372_v9  ;;  %vm475_vm11 = vweird.f32 %v1427_v34  ;;  %vm316_vm13 = vmor %vm314_vm7, %vm315_vm9 }
  0xa6   :  { %v507_v11 = vsel %vm1437_vm5, %v1365_v15, %v503_v62  ;;  %v470_v21 = vmul.f32 %v1427_v34, %v469_v35  ;;  %1015 = vrsqrt.f32 %v1444_v41  ;;  %v311_v51 = vmul.f32 0.5, %v310_v0  ;;  %vm1498_vm0 = vmor %vm474_vm8, %vm475_vm11 }
  0xa7   :  { %v493_v46 = vmul.f32 %v1402_v33, %v492_v45  ;;  %v320_v15 = vmul.f32 %v1433_v27, %v319_v47  ;;  %v1460_v22 = vpop.eup %1011  ;;  %v557_v57 = vmul.f32 %v507_v11, %v1183_v12  ;;  %v1468_v52 = vmax.f32 %v129_v17, 1e-24 }
  0xa8   :  { %v471_v5 = vmul.f32 0.5, %v470_v21  ;;  %v312_v53 = vsub.f32 1.5, %v311_v51  ;;  %v479_v3 = vmul.f32 %v1460_v22, %v1417_v63  ;;  %vm325_vm12 = vweird.f32 %v1433_v27 }
  0xa9   :  { %v497_v1 = vsel %vm496_vm10, %v1402_v33, %v493_v46  ;;  %v321_v6 = vmul.f32 0.5, %v320_v15  ;;  %1017 = vrsqrt.f32 %v1468_v52  ;;  %vm324_vm14 = vweird.f32 %v1372_v9 }
  0xaa   :  { %v1473_v10 = vpop.xlane.xlu1 %124  ;;  %v886_v12 = vld [vmem:[#allocation2 + $0x28] sm:$0xff]  ;;  %v556_v16 = vmul.f32 %v497_v1, %v1185_v13  ;;  %v472_v23 = vsub.f32 1.5, %v471_v5  ;;  %v127_v17 = vpop.xlane.xlu2 %126  ;;  %v313_v2 = vmul.f32 %v1421_v4, %v312_v53  ;;  %v480_v39 = vmul.f32 %v1460_v22, %v479_v3  ;;  %vm326_vm2 = vmor %vm324_vm14, %vm325_vm12 }
  0xab   :  { %v163_v29 = vpop.xlane.xlu0 %162  ;;  %v1475_v7 = vpop.eup %1013  ;;  %v878_v33 = vld [vmem:[#allocation2 + $0x48] sm:$0xff]  ;;  %v322_v62 = vsub.f32 1.5, %v321_v6  ;;  %769 = vmatpush.bf16.xpose.msra.mxu1 %v886_v12  ;;  %vm484_vm15 = vweird.f32 %v1417_v63  ;;  %vm454_vm1 = vweird.f32 %v1444_v41  ;;  %vm485_vm3 = vweird.f32 %v1460_v22 }
  0xac   :  { %v299_v40 = vmul.f32 %v1475_v7, %v1425_v8  ;;  %v1484_v59 = vpop.eup %1015  ;;  %v960_v35 = vpack.c.bf16 %v557_v57, %v556_v16  ;;  %v473_v13 = vmul.f32 %v1427_v34, %v472_v23  ;;  %755 = vmatpush.bf16.xpose.msra.mxu0 %v878_v33  ;;  %v317_v11 = vsel %vm316_vm13, %v1421_v4, %v313_v2  ;;  %vm486_vm6 = vmor %vm484_vm15, %vm485_vm3  ;;  %v877_v23 = vld [vmem:[#allocation2 + $0x8] sm:$0xff] }
  0xad   :  { %v323_v58 = vmul.f32 %v1433_v27, %v322_v62  ;;  %v481_v0 = vmul.f32 0.5, %v480_v39  ;;  %v449_v47 = vmul.f32 %v1484_v59, %v1444_v41  ;;  %v538_v9 = vmul.f32 %v317_v11, %v1187_v14 }
  0xae   :  { %980 = vst [vmem:[#allocation2 + $0x78] sm:$0xff] %v960_v35   ;;  %v300_v28 = vmul.f32 %v1475_v7, %v299_v40  ;;  %vm304_vm4 = vweird.f32 %v1425_v8  ;;  %v477_v4 = vsel %vm1498_vm0, %v1427_v34, %v473_v13  ;;  %v1520_v5 = vmax.f32 %v163_v29, 1e-24 }
  0xaf   :  { %v327_v21 = vsel %vm326_vm2, %v1433_v27, %v323_v58  ;;  %v482_v46 = vsub.f32 1.5, %v481_v0  ;;  %v450_v51 = vmul.f32 %v1484_v59, %v449_v47  ;;  %v1517_v15 = vpop.eup %1017  ;;  %v1522_v1 = vmax.f32 %v127_v17, 1e-24 }
  0xb0   :  { %v539_v14 = vmul.f32 %v327_v21, %v1197_v19  ;;  %v301_v57 = vmul.f32 0.5, %v300_v28  ;;  %vm305_vm5 = vweird.f32 %v1475_v7  ;;  %v289_v34 = vmul.f32 %v1517_v15, %v1468_v52 }
  0xb1   :  { %v483_v53 = vmul.f32 %v1460_v22, %v482_v46  ;;  %v451_v6 = vmul.f32 0.5, %v450_v51  ;;  %v554_v12 = vmul.f32 %v477_v4, %v1195_v18  ;;  %1019 = vrsqrt.f32 %v1520_v5  ;;  %vm1552_vm8 = vmor %vm304_vm4, %vm305_vm5 }
  0xb2   :  { %v159_v3 = vpop.xlane.xlu1 %158  ;;  %v915_v16 = vpack.c.bf16 %v539_v14, %v538_v9  ;;  %v302_v19 = vsub.f32 1.5, %v301_v57  ;;  %v121_v29 = vpop.xlane.xlu2 %120  ;;  %v290_v2 = vmul.f32 %v1517_v15, %v289_v34  ;;  %1021 = vrsqrt.f32 %v1522_v1 }
  0xb3   :  { %v157_v27 = vpop.xlane.xlu0 %156  ;;  %v487_v17 = vsel %vm486_vm6, %v1460_v22, %v483_v53  ;;  %v452_v33 = vsub.f32 1.5, %v451_v6  ;;  %vm455_vm7 = vweird.f32 %v1484_v59  ;;  %v1541_v62 = vmax.f32 %v1473_v10, 1e-24 }
  0xb4   :  { %971 = vst [vmem:[#allocation2 + $0x68] sm:$0xff] %v915_v16   ;;  %v555_v18 = vmul.f32 %v487_v17, %v1199_v20  ;;  %v303_v63 = vmul.f32 %v1475_v7, %v302_v19  ;;  %756 = vmatpush.bf16.xpose.msra.mxu0 %v877_v23  ;;  %v291_v40 = vmul.f32 0.5, %v290_v2  ;;  %v1544_v22 = vmax.f32 %v157_v27, 1e-24  ;;  %vm1568_vm10 = vmor %vm454_vm1, %vm455_vm7 }
  0xb5   :  { %v453_v39 = vmul.f32 %v1484_v59, %v452_v33  ;;  %v1546_v35 = vmax.f32 %v159_v3, 1e-24  ;;  %v885_v13 = vld [vmem:[#allocation2 + $0x78] sm:$0xff]  ;;  %1023 = vrsqrt.f32 %v1541_v62  ;;  %vm295_vm9 = vweird.f32 %v1517_v15 }
  0xb6   :  { %v955_v11 = vpack.c.bf16 %v555_v18, %v554_v12  ;;  %v307_v10 = vsel %vm1552_vm8, %v1475_v7, %v303_v63  ;;  %v292_v45 = vsub.f32 1.5, %v291_v40  ;;  %1025 = vrsqrt.f32 %v1544_v22  ;;  %770 = vmatpush.bf16.xpose.msra.mxu1 %v885_v13 }
  0xb7   :  { %v1562_v58 = vpop.eup %1019  ;;  %vm294_vm11 = vweird.f32 %v1468_v52  ;;  %1027 = vrsqrt.f32 %v1546_v35  ;;  %v457_v0 = vsel %vm1568_vm10, %v1484_v59, %v453_v39  ;;  %v1582_v41 = vmax.f32 %v121_v29, 1e-24 }
  0xb8   :  { %979 = vst [vmem:[#allocation2 + $0x70] sm:$0xff] %v955_v11   ;;  %v1574_v7 = vpop.eup %1021  ;;  %v293_v47 = vmul.f32 %v1517_v15, %v292_v45  ;;  %v459_v9 = vmul.f32 %v1562_v58, %v1520_v5  ;;  %v537_v21 = vmul.f32 %v307_v10, %v1207_v24  ;;  %vm296_vm12 = vmor %vm294_vm11, %vm295_vm9  ;;  %vm464_vm13 = vweird.f32 %v1520_v5 }
  0xb9   :  { %v279_v52 = vmul.f32 %v1574_v7, %v1522_v1  ;;  %1029 = vrsqrt.f32 %v1582_v41  ;;  %vm284_vm14 = vweird.f32 %v1522_v1  ;;  %vm274_vm15 = vweird.f32 %v1541_v62 }
  0xba   :  { %v153_v28 = vpop.xlane.xlu1 %152  ;;  %v155_v51 = vpop.xlane.xlu2 %154  ;;  %v297_v14 = vsel %vm296_vm12, %v1517_v15, %v293_v47  ;;  %v460_v57 = vmul.f32 %v1562_v58, %v459_v9  ;;  %v552_v15 = vmul.f32 %v457_v0, %v1211_v26  ;;  %vm434_vm0 = vweird.f32 %v1544_v22 }
  0xbb   :  { %v123_v4 = vpop.xlane.xlu0 %122  ;;  %v1589_v46 = vmax.f32 %v153_v28, 1e-24  ;;  %v876_v24 = vld [vmem:[#allocation2 + $0x68] sm:$0xff]  ;;  %v1597_v53 = vpop.eup %1023  ;;  %v536_v6 = vmul.f32 %v297_v14, %v1209_v25  ;;  %v280_v34 = vmul.f32 %v1574_v7, %v279_v52  ;;  %vm465_vm1 = vweird.f32 %v1562_v58 }
  0xbc   :  { %v1591_v59 = vmax.f32 %v123_v4, 1e-24  ;;  %v1603_v27 = vpop.eup %1025  ;;  %v461_v3 = vmul.f32 0.5, %v460_v57  ;;  %v269_v12 = vmul.f32 %v1597_v53, %v1541_v62  ;;  %757 = vmatpush.bf16.xpose.msra.mxu0 %v876_v24  ;;  %vm444_vm2 = vweird.f32 %v1546_v35  ;;  %vm466_vm6 = vmor %vm464_vm13, %vm465_vm1 }
  0xbd   :  { %1031 = vrsqrt.f32 %v1589_v46  ;;  %v1609_v16 = vpop.eup %1027  ;;  %v910_v25 = vpack.c.bf16 %v537_v21, %v536_v6  ;;  %v281_v19 = vmul.f32 0.5, %v280_v34  ;;  %v429_v29 = vmul.f32 %v1603_v27, %v1544_v22 }
  0xbe   :  { %1033 = vrsqrt.f32 %v1591_v59  ;;  %v462_v23 = vsub.f32 1.5, %v461_v3  ;;  %v270_v26 = vmul.f32 %v1597_v53, %v269_v12  ;;  %v439_v17 = vmul.f32 %v1609_v16, %v1546_v35 }
  0xbf   :  { %v884_v33 = vld [vmem:[#allocation2 + $0x70] sm:$0xff]  ;;  %970 = vst [vmem:[#allocation2 + $0x50] sm:$0xff] %v910_v25   ;;  %v282_v2 = vsub.f32 1.5, %v281_v19  ;;  %vm285_vm3 = vweird.f32 %v1574_v7  ;;  %vm275_vm4 = vweird.f32 %v1597_v53  ;;  %v430_v18 = vmul.f32 %v1603_v27, %v429_v29  ;;  %v1623_v63 = vpop.eup %1029 }
  0xc0   :  { %v463_v39 = vmul.f32 %v1562_v58, %v462_v23  ;;  %v271_v40 = vmul.f32 0.5, %v270_v26  ;;  %vm435_vm5 = vweird.f32 %v1603_v27  ;;  %v440_v13 = vmul.f32 %v1609_v16, %v439_v17  ;;  %771 = vmatpush.bf16.xpose.msra.mxu1 %v884_v33  ;;  %vm286_vm8 = vmor %vm284_vm14, %vm285_vm3 }
  0xc1   :  { %v283_v45 = vmul.f32 %v1574_v7, %v282_v2  ;;  %v431_v8 = vmul.f32 0.5, %v430_v18  ;;  %vm445_vm7 = vweird.f32 %v1609_v16  ;;  %v249_v0 = vmul.f32 %v1623_v63, %v1582_v41  ;;  %vm276_vm9 = vmor %vm274_vm15, %vm275_vm4 }
  0xc2   :  { %v119_v11 = vpop.xlane.xlu1 %118  ;;  %v467_v47 = vsel %vm466_vm6, %v1562_v58, %v463_v39  ;;  %v272_v9 = vsub.f32 1.5, %v271_v40  ;;  %v441_v28 = vmul.f32 0.5, %v440_v13  ;;  %v149_v4 = vpop.xlane.xlu2 %148  ;;  %v1652_v34 = vmax.f32 %v155_v51, 1e-24  ;;  %vm436_vm10 = vmor %vm434_vm0, %vm435_vm5 }
  0xc3   :  { %v117_v20 = vpop.xlane.xlu0 %116  ;;  %v1628_v10 = vpop.eup %1031  ;;  %v553_v52 = vmul.f32 %v467_v47, %v1219_v30  ;;  %v287_v14 = vsel %vm286_vm8, %v1574_v7, %v283_v45  ;;  %v432_v57 = vsub.f32 1.5, %v431_v8  ;;  %v250_v58 = vmul.f32 %v1623_v63, %v249_v0  ;;  %vm446_vm11 = vmor %vm444_vm2, %vm445_vm7 }
  0xc4   :  { %v409_v5 = vmul.f32 %v1628_v10, %v1589_v46  ;;  %v1645_v21 = vpop.eup %1033  ;;  %v273_v24 = vmul.f32 %v1597_v53, %v272_v9  ;;  %v442_v6 = vsub.f32 1.5, %v441_v28  ;;  %v535_v12 = vmul.f32 %v287_v14, %v1223_v32 }
  0xc5   :  { %v950_v3 = vpack.c.bf16 %v553_v52, %v552_v15  ;;  %v433_v30 = vmul.f32 %v1603_v27, %v432_v57  ;;  %v251_v7 = vmul.f32 0.5, %v250_v58  ;;  %v259_v32 = vmul.f32 %v1645_v21, %v1591_v59 }
  0xc6   :  { %v410_v1 = vmul.f32 %v1628_v10, %v409_v5  ;;  %v277_v25 = vsel %vm276_vm9, %v1597_v53, %v273_v24  ;;  %v443_v51 = vmul.f32 %v1609_v16, %v442_v6  ;;  %v875_v19 = vld [vmem:[#allocation2 + $0x50] sm:$0xff]  ;;  %vm254_vm12 = vweird.f32 %v1582_v41 }
  0xc7   :  { %978 = vst [vmem:[#allocation2 + $0x60] sm:$0xff] %v950_v3   ;;  %v534_v62 = vmul.f32 %v277_v25, %v1221_v31  ;;  %v437_v29 = vsel %vm436_vm10, %v1603_v27, %v433_v30  ;;  %v252_v53 = vsub.f32 1.5, %v251_v7  ;;  %v260_v17 = vmul.f32 %v1645_v21, %v259_v32  ;;  %758 = vmatpush.bf16.xpose.msra.mxu0 %v875_v19 }
  0xc8   :  { %v411_v15 = vmul.f32 0.5, %v410_v1  ;;  %v550_v22 = vmul.f32 %v437_v29, %v1231_v36  ;;  %v447_v23 = vsel %vm446_vm11, %v1609_v16, %v443_v51  ;;  %1035 = vrsqrt.f32 %v1652_v34 }
  0xc9   :  { %v905_v18 = vpack.c.bf16 %v535_v12, %v534_v62  ;;  %v551_v31 = vmul.f32 %v447_v23, %v1233_v37  ;;  %v253_v35 = vmul.f32 %v1623_v63, %v252_v53  ;;  %vm255_vm13 = vweird.f32 %v1623_v63 }
  0xca   :  { %v412_v26 = vsub.f32 1.5, %v411_v15  ;;  %v113_v2 = vpop.xlane.xlu1 %112  ;;  %v261_v36 = vmul.f32 0.5, %v260_v17  ;;  %v1682_v27 = vmax.f32 %v149_v4, 1e-24  ;;  %vm415_vm14 = vweird.f32 %v1628_v10  ;;  %v115_v45 = vpop.xlane.xlu2 %114  ;;  %vm1694_vm0 = vmor %vm254_vm12, %vm255_vm13 }
  0xcb   :  { %v151_v33 = vpop.xlane.xlu0 %150  ;;  %969 = vst [vmem:[#allocation2 + $0x18] sm:$0xff] %v905_v18   ;;  %v945_v16 = vpack.c.bf16 %v551_v31, %v550_v22  ;;  %v1685_v39 = vmax.f32 %v119_v11, 1e-24  ;;  %v1687_v40 = vmax.f32 %v117_v20, 1e-24  ;;  %vm265_vm15 = vweird.f32 %v1645_v21 }
  0xcc   :  { %v413_v37 = vmul.f32 %v1628_v10, %v412_v26  ;;  %v262_v13 = vsub.f32 1.5, %v261_v36  ;;  %1037 = vrsqrt.f32 %v1682_v27  ;;  %vm414_vm1 = vweird.f32 %v1589_v46 }
  0xcd   :  { %977 = vst [vmem:[#allocation2 + $0x38] sm:$0xff] %v945_v16   ;;  %vm264_vm2 = vweird.f32 %v1591_v59  ;;  %1039 = vrsqrt.f32 %v1685_v39  ;;  %v257_v11 = vsel %vm1694_vm0, %v1623_v63, %v253_v35  ;;  %vm1704_vm3 = vmor %vm414_vm1, %vm415_vm14  ;;  %v1710_v0 = vmax.f32 %v151_v33, 1e-24 }
  0xce   :  { %v263_v41 = vmul.f32 %v1645_v21, %v262_v13  ;;  %1041 = vrsqrt.f32 %v1687_v40  ;;  %v883_v47 = vld [vmem:[#allocation2 + $0x60] sm:$0xff]  ;;  %v1712_v46 = vpop.eup %1035  ;;  %vm266_vm4 = vmor %vm264_vm2, %vm265_vm15  ;;  %v1716_v59 = vmax.f32 %v115_v45, 1e-24  ;;  %v1718_v9 = vmax.f32 %v113_v2, 1e-24 }
  0xcf   :  { %v417_v63 = vsel %vm1704_vm3, %v1628_v10, %v413_v37  ;;  %v419_v5 = vmul.f32 %v1712_v46, %v1652_v34  ;;  %1043 = vrsqrt.f32 %v1710_v0  ;;  %772 = vmatpush.bf16.xpose.msra.mxu1 %v883_v47  ;;  %v532_v52 = vmul.f32 %v257_v11, %v1235_v38 }
  0xd0   :  { %v267_v28 = vsel %vm266_vm4, %v1645_v21, %v263_v41  ;;  %1045 = vrsqrt.f32 %v1716_v59  ;;  %vm424_vm5 = vweird.f32 %v1652_v34  ;;  %v1740_v38 = vmul.f32 %v417_v63, %v1243_v42 }
  0xd1   :  { %v533_v14 = vmul.f32 %v267_v28, %v1245_v43  ;;  %v420_v10 = vmul.f32 %v1712_v46, %v419_v5  ;;  %1047 = vrsqrt.f32 %v1718_v9  ;;  %vm394_vm6 = vweird.f32 %v1682_v27 }
  0xd2   :  { %v147_v57 = vpop.xlane.xlu1 %146  ;;  %v1730_v58 = vpop.eup %1037  ;;  %v874_v21 = vld [vmem:[#allocation2 + $0x18] sm:$0xff]  ;;  %vm244_vm7 = vweird.f32 %v1685_v39  ;;  %vm425_vm8 = vweird.f32 %v1712_v46  ;;  %vm234_vm9 = vweird.f32 %v1687_v40  ;;  %vm224_vm12 = vweird.f32 %v1716_v59 }
  0xd3   :  { %v145_v4 = vpop.xlane.xlu0 %144  ;;  %v1737_v6 = vpop.eup %1039  ;;  %v900_v43 = vpack.c.bf16 %v533_v14, %v532_v52  ;;  %v389_v1 = vmul.f32 %v1730_v58, %v1682_v27  ;;  %v421_v12 = vmul.f32 0.5, %v420_v10  ;;  %759 = vmatpush.bf16.xpose.msra.mxu0 %v874_v21  ;;  %v1751_v7 = vmax.f32 %v147_v57, 1e-24  ;;  %vm426_vm15 = vmor %vm424_vm5, %vm425_vm8 }
  0xd4   :  { %v1735_v24 = vmax.f32 %v145_v4, 1e-24  ;;  %v1745_v3 = vpop.eup %1041  ;;  %v239_v30 = vmul.f32 %v1737_v6, %v1685_v39  ;;  %v882_v42 = vld [vmem:[#allocation2 + $0x38] sm:$0xff]  ;;  %vm395_vm10 = vweird.f32 %v1730_v58  ;;  %vm245_vm11 = vweird.f32 %v1737_v6 }
  0xd5   :  { %968 = vst [vmem:[#allocation2 + $0x58] sm:$0xff] %v900_v43   ;;  %v390_v25 = vmul.f32 %v1730_v58, %v389_v1  ;;  %v229_v51 = vmul.f32 %v1745_v3, %v1687_v40  ;;  %v1758_v15 = vpop.eup %1043  ;;  %v422_v32 = vsub.f32 1.5, %v421_v12  ;;  %vm235_vm13 = vweird.f32 %v1745_v3  ;;  %vm1796_vm2 = vmor %vm394_vm6, %vm395_vm10 }
  0xd6   :  { %1049 = vrsqrt.f32 %v1735_v24  ;;  %v240_v19 = vmul.f32 %v1737_v6, %v239_v30  ;;  %v1764_v62 = vpop.eup %1045  ;;  %v399_v22 = vmul.f32 %v1758_v15, %v1710_v0  ;;  %vm404_vm14 = vweird.f32 %v1710_v0  ;;  %vm246_vm3 = vmor %vm244_vm7, %vm245_vm11 }
  0xd7   :  { %v391_v29 = vmul.f32 0.5, %v390_v25  ;;  %v230_v53 = vmul.f32 %v1745_v3, %v229_v51  ;;  %v1771_v23 = vpop.eup %1047  ;;  %v423_v26 = vmul.f32 %v1712_v46, %v422_v32  ;;  %v219_v33 = vmul.f32 %v1764_v62, %v1716_v59  ;;  %773 = vmatpush.bf16.xpose.msra.mxu1 %v882_v42  ;;  %vm236_vm5 = vmor %vm234_vm9, %vm235_vm13 }
  0xd8   :  { %v241_v17 = vmul.f32 0.5, %v240_v19  ;;  %1051 = vrsqrt.f32 %v1751_v7  ;;  %v400_v31 = vmul.f32 %v1758_v15, %v399_v22  ;;  %v209_v35 = vmul.f32 %v1771_v23, %v1718_v9 }
  0xd9   :  { %v392_v2 = vsub.f32 1.5, %v391_v29  ;;  %v231_v18 = vmul.f32 0.5, %v230_v53  ;;  %v427_v16 = vsel %vm426_vm15, %v1712_v46, %v423_v26  ;;  %vm405_vm0 = vweird.f32 %v1758_v15 }
  0xda   :  { %v242_v37 = vsub.f32 1.5, %v241_v17  ;;  %v220_v13 = vmul.f32 %v1764_v62, %v219_v33  ;;  %vm214_vm1 = vweird.f32 %v1718_v9  ;;  %v549_v34 = vmul.f32 %v427_v16, %v1247_v44  ;;  %vm406_vm6 = vmor %vm404_vm14, %vm405_vm0 }
  0xdb   :  { %v393_v45 = vmul.f32 %v1730_v58, %v392_v2  ;;  %v232_v8 = vsub.f32 1.5, %v231_v18  ;;  %v401_v11 = vmul.f32 0.5, %v400_v31  ;;  %v210_v46 = vmul.f32 %v1771_v23, %v209_v35  ;;  %v624_v2 = vld [vmem:[#allocation3] sm:$0xff]  ;;  %v625_v18 = vld [vmem:[#allocation3 + $0x8] sm:$0xff] }
  0xdc   :  { %v1784_v36 = vpop.eup %1049  ;;  %v243_v41 = vmul.f32 %v1737_v6, %v242_v37  ;;  %v221_v47 = vmul.f32 0.5, %v220_v13  ;;  %v873_v63 = vld [vmem:[#allocation2 + $0x58] sm:$0xff]  ;;  %v940_v28 = vpack.c.bf16 %v549_v34, %v1740_v38  ;;  %vm225_vm4 = vweird.f32 %v1764_v62 }
  0xdd   :  { %v369_v44 = vmul.f32 %v1784_v36, %v1735_v24  ;;  %v233_v27 = vmul.f32 %v1745_v3, %v232_v8  ;;  %v402_v5 = vsub.f32 1.5, %v401_v11  ;;  %v397_v52 = vsel %vm1796_vm2, %v1730_v58, %v393_v45  ;;  %760 = vmatpush.bf16.xpose.msra.mxu0 %v873_v63  ;;  %vm226_vm8 = vmor %vm224_vm12, %vm225_vm4 }
  0xde   :  { %v1052_v4 = vpop.eup %1051  ;;  %v247_v14 = vsel %vm246_vm3, %v1737_v6, %v243_v41  ;;  %v222_v57 = vsub.f32 1.5, %v221_v47  ;;  %v211_v39 = vmul.f32 0.5, %v210_v46  ;;  %976 = vst [vmem:[#allocation2 + $0x10] sm:$0xff] %v940_v28   ;;  %vm215_vm7 = vweird.f32 %v1771_v23 }
  0xdf   :  { %v531_v10 = vmul.f32 %v247_v14, %v1255_v48  ;;  %v237_v21 = vsel %vm236_vm5, %v1745_v3, %v233_v27  ;;  %v403_v38 = vmul.f32 %v1758_v15, %v402_v5  ;;  %v370_v43 = vmul.f32 %v1784_v36, %v369_v44  ;;  %vm216_vm9 = vmor %vm214_vm1, %vm215_vm7 }
  0xe0   :  { %v530_v58 = vmul.f32 %v237_v21, %v1257_v49  ;;  %v223_v40 = vmul.f32 %v1764_v62, %v222_v57  ;;  %v212_v6 = vsub.f32 1.5, %v211_v39  ;;  %v546_v48 = vmul.f32 %v397_v52, %v1259_v50 }
  0xe1   :  { %v407_v1 = vsel %vm406_vm6, %v1758_v15, %v403_v38  ;;  %v371_v49 = vmul.f32 0.5, %v370_v43  ;;  %v379_v3 = vmul.f32 %v1052_v4, %v1751_v7  ;;  %vm375_vm10 = vweird.f32 %v1784_v36 }
  0xe2   :  { %v895_v12 = vpack.c.bf16 %v531_v10, %v530_v58  ;;  %v547_v0 = vmul.f32 %v407_v1, %v1267_v54  ;;  %v227_v30 = vsel %vm226_vm8, %v1764_v62, %v223_v40  ;;  %v213_v42 = vmul.f32 %v1771_v23, %v212_v6 }
  0xe3   :  { %v529_v25 = vmul.f32 %v227_v30, %v1271_v56  ;;  %v372_v50 = vsub.f32 1.5, %v371_v49  ;;  %v380_v59 = vmul.f32 %v1052_v4, %v379_v3  ;;  %vm374_vm11 = vweird.f32 %v1735_v24 }
  0xe4   :  { %967 = vst [vmem:[#allocation2] sm:$0xff] %v895_v12   ;;  %v935_v51 = vpack.c.bf16 %v547_v0, %v546_v48  ;;  %v217_v15 = vsel %vm216_vm9, %v1771_v23, %v213_v42  ;;  %vm376_vm12 = vmor %vm374_vm11, %vm375_vm10  ;;  %vm385_vm13 = vweird.f32 %v1052_v4  ;;  %vm384_vm14 = vweird.f32 %v1751_v7 }
  0xe5   :  { %v528_v32 = vmul.f32 %v217_v15, %v1269_v55  ;;  %v373_v54 = vmul.f32 %v1784_v36, %v372_v50  ;;  %v381_v19 = vmul.f32 0.5, %v380_v59  ;;  %v881_v56 = vld [vmem:[#allocation2 + $0x10] sm:$0xff]  ;;  %vm386_vm15 = vmor %vm384_vm14, %vm385_vm13  ;;  %v626_v35 = vpack.c.bf16 %v625_v18, %v624_v2 }
  0xe6   :  { %975 = vst [vmem:[#allocation2 + $0x20] sm:$0xff] %v935_v51   ;;  %774 = vmatpush.bf16.xpose.msra.mxu1 %v881_v56 }
  0xe7   :  { %v890_v9 = vpack.c.bf16 %v529_v25, %v528_v32  ;;  %v377_v62 = vsel %vm376_vm12, %v1784_v36, %v373_v54  ;;  %v382_v29 = vsub.f32 1.5, %v381_v19 }
  0xe8   :  { %v544_v55 = vmul.f32 %v377_v62, %v1279_v60 }
  0xe9   :  { %891 = vst [vmem:[#allocation2 + $0x30] sm:$0xff] %v890_v9   ;;  %v383_v53 = vmul.f32 %v1052_v4, %v382_v29 }
  0xeb   :  { %v387_v22 = vsel %vm386_vm15, %v1052_v4, %v383_v53  ;;  %v872_v23 = vld [vmem:[#allocation2] sm:$0xff] }
  0xec   :  { %v545_v24 = vmul.f32 %v387_v22, %v1281_v61  ;;  %761 = vmatpush.bf16.xpose.msra.mxu0 %v872_v23 }
  0xed   :  { %v880_v26 = vld [vmem:[#allocation2 + $0x20] sm:$0xff] }
  0xee   :  { %v930_v17 = vpack.c.bf16 %v545_v24, %v544_v55  ;;  %775 = vmatpush.bf16.xpose.msra.mxu1 %v880_v26 }
  0xf0   :  { %974 = vst [vmem:[#allocation2 + $0x40] sm:$0xff] %v930_v17   ;;  %v871_v33 = vld [vmem:[#allocation2 + $0x30] sm:$0xff] }
  0xf4   :  { %762 = vmatpush.bf16.xpose.msra.mxu0 %v871_v33 }
  0xf7   :  { %v879_v31 = vld [vmem:[#allocation2 + $0x40] sm:$0xff] }
  0xf8   :  { %776 = vmatpush.bf16.xpose.msra.mxu1 %v879_v31 }
  0xfb   :  { %763 = vmatmul.bf16.vlgmr.msra.gmra.mxu0 %v626_v35 }
  0xff   :  { %777 = vmatmul.bf16.vlgmr.msra.gmra.mxu1 %v626_v35 }
 0x178   :  { %v764_v60 = vpop.f32.mrf.mxu0 }
 0x179   :  { %783 = vst [vmem:[#allocation8] sm:$0xff] %v764_v60 }
 0x17c   :  { %v778_v7 = vpop.f32.mrf.mxu1 }
 0x17d   :  { %784 = vst [vmem:[#allocation8 + $0x8] sm:$0xff] %v778_v7 }
 0x180   :  { %v766_v61 = vpop.f32.mrf.mxu0 }
 0x181   :  { %785 = vst [vmem:[#allocation8 + $0x10] sm:$0xff] %v766_v61 }
 0x184   :  { %v780_v36 = vpop.f32.mrf.mxu1 }
 0x185   :  { %786 = vst [vmem:[#allocation8 + $0x18] sm:$0xff] %v780_v36 }
 0x186   :  { %799 = dma.vmem_to_hbm [thread:$0]  %s792_s1, 512, %s794_s23, [#allocation5], %s1136_s24, %s1136_s24, %s1137_s25  }
 0x187   :  { %1129 = dma.done.wait [#allocation5], 512  }
 0x188   :  { %1130 = vsyncadd [#allocation5], 4294966784 }
 0x189   :  { %804 = vsyncpa [#allocation4], 1 }
 0x18a   :  { %805 = vsyncpa [#allocation7], 1 }
 0x18b   :  { %806 = vsyncpa [#allocation5], 1 }

</bundles_post_ra>
